<compile_context>
chip_gen: v6e
topology: v6e:2x2x1
jax: 0.10.0
libtpu: 0.0.40
codegen_flags: <defaults>
</compile_context>

<pallas_src>
import jax
import jax.numpy as jnp
from jax.experimental import pallas as pl
from jax.experimental.pallas import tpu as pltpu


def _gradnorm_mul_kernel(w_ref, loss_ref, out_ref):
    # weighted_loss = weights * loss ; weights = exp(log_w) is precomputed and
    # cached in the wrapper (it only changes when the log weights are updated).
    out_ref[...] = w_ref[...] * loss_ref[...]


def _weighted_losses_pallas(weights_2d, loss_2d):
    """(1, N) * (1, N) -> (1, N) via a single no-grid, full-block Pallas call."""
    return pl.pallas_call(
        _gradnorm_mul_kernel,
        out_shape=jax.ShapeDtypeStruct(loss_2d.shape, jnp.float32),
        in_specs=[
            pl.BlockSpec(memory_space=pltpu.MemorySpace.VMEM),
            pl.BlockSpec(memory_space=pltpu.MemorySpace.VMEM),
        ],
        out_specs=pl.BlockSpec(memory_space=pltpu.MemorySpace.VMEM),
    )(weights_2d, loss_2d)


@jax.jit
def _gradnorm_forward(weights_2d, *task_losses):
    """One jitted dispatch: stack scalar losses, multiply, unstack per task."""
    loss_vec = jnp.stack(
        [jnp.asarray(l, jnp.float32).reshape(()) for l in task_losses])
    weighted = _weighted_losses_pallas(weights_2d, loss_vec[None, :])[0]
    # Per-task 0-d outputs are produced inside the same executable (no extra
    # eager gather dispatches in the wrapper).
    return tuple(weighted[i] for i in range(len(task_losses)))


class GradNorm:
    """JAX/Pallas mirror of the PyTorch GradNorm module's forward pass."""

    def __init__(self, initial_loss_weights: dict, alpha: float = 1.5):
        self.task_names = list(initial_loss_weights.keys())
        self.alpha = alpha
        self.log_loss_weights = jnp.log(
            jnp.asarray([initial_loss_weights[k] for k in self.task_names],
                        dtype=jnp.float32))
        # Cached weights = exp(log_w), lane-oriented (1, N). Recomputed only
        # when the log weights change, not every forward.
        self._weights_2d = jnp.exp(self.log_loss_weights)[None, :]
        # Host-side bookkeeping (PyTorch records losses[name].item() once).
        self.initial_losses = {name: None for name in self.task_names}
        # TODO(synk): update_weights() (per-task grad norms w.r.t. shared
        # parameters + in-place step on log_loss_weights) is an optimizer-side
        # autograd procedure outside a single forward kernel; not implemented.

    def set_log_loss_weights(self, log_loss_weights):
        """Update the log weights and refresh the cached exp(log_w)."""
        self.log_loss_weights = jnp.asarray(log_loss_weights, jnp.float32)
        self._weights_2d = jnp.exp(self.log_loss_weights)[None, :]

    def __call__(self, losses: dict) -> dict:
        if not all(name in losses for name in self.task_names):
            raise ValueError(
                f"GradNorm: Missing losses for some tasks. "
                f"Expected: {self.task_names}, Got: {list(losses.keys())}")

        # Record initial losses once, with a single batched device->host copy
        # instead of per-task blocking float() round trips.
        if any(self.initial_losses[n] is None for n in self.task_names):
            vals = jax.device_get(
                jnp.stack([jnp.asarray(losses[n], jnp.float32).reshape(())
                           for n in self.task_names]))
            for name, v in zip(self.task_names, vals):
                if self.initial_losses[name] is None:
                    self.initial_losses[name] = float(v)

        ordered = [losses[name] for name in self.task_names]
        weighted = _gradnorm_forward(self._weights_2d, *ordered)
        return {name: weighted[i] for i, name in enumerate(self.task_names)}


if __name__ == "__main__":
    key = jax.random.PRNGKey(0)

    # Small, deterministic setup consistent with the module's forward:
    # a handful of tasks, each with a scalar loss.
    initial_loss_weights = {"segmentation": 1.0, "depth": 0.5, "normals": 2.0}
    task_names = list(initial_loss_weights.keys())
    num_tasks = len(task_names)

    raw = jax.random.uniform(key, (num_tasks,), dtype=jnp.float32,
                             minval=0.1, maxval=2.0)
    losses = {name: raw[i] for i, name in enumerate(task_names)}

    gradnorm = GradNorm(initial_loss_weights, alpha=1.5)
    weighted = gradnorm(losses)
    jax.block_until_ready(weighted)

    # Reference: exp(log_w) * loss, in task order.
    ref = jnp.exp(gradnorm.log_loss_weights) * raw
    got = jnp.stack([weighted[name] for name in task_names])

    assert got.shape == (num_tasks,) and got.dtype == jnp.float32
    assert jnp.allclose(got, ref, rtol=1e-6, atol=1e-6), (got, ref)
    # initial_losses were recorded host-side (one batched transfer) on first call.
    assert all(gradnorm.initial_losses[n] is not None for n in task_names)

    print("KERNEL_OK")
</pallas_src>

<mosaic_0001>
module attributes {stable_mosaic.version = 11 : i64} {
  func.func @_gradnorm_mul_kernel(%arg0: memref<1x3xf32, #tpu.memory_space<vmem>>, %arg1: memref<1x3xf32, #tpu.memory_space<vmem>>, %arg2: memref<1x3xf32, #tpu.memory_space<vmem>>) attributes {dimension_semantics = [], scalar_prefetch = 0 : i64, scratch_operands = 0 : i64, tpu.core_type = #tpu.core_type<tc>} {
    %c0 = arith.constant 0 : index
    %c0_0 = arith.constant 0 : index
    %0 = vector.load %arg0[%c0, %c0_0] : memref<1x3xf32, #tpu.memory_space<vmem>>, vector<1x3xf32>
    %c0_1 = arith.constant 0 : index
    %c0_2 = arith.constant 0 : index
    %1 = vector.load %arg1[%c0_1, %c0_2] : memref<1x3xf32, #tpu.memory_space<vmem>>, vector<1x3xf32>
    %2 = arith.mulf %0, %1 : vector<1x3xf32>
    %c0_3 = arith.constant 0 : index
    %c0_4 = arith.constant 0 : index
    %3 = vector.load %arg2[%c0_3, %c0_4] : memref<1x3xf32, #tpu.memory_space<vmem>>, vector<1x3xf32>
    tpu.vector_store %arg2[%c0_3, %c0_4], %2 {strides = array<i32>} : memref<1x3xf32, #tpu.memory_space<vmem>>, vector<1x3xf32>,
    return
  }
}

</mosaic_0001>

<bundles_post_ra>
// kernel: _gradnorm_forward.1
= control target key start
LH: loop header
LB: loop body
LE: loop exit
PB: predicated region body
PF: predicated region fallthrough
CT: control target
= control target key end

     0   :  { %vm14_vm0 = vcmask 16384   ;;  %s44_s0 = inlined_call_operand.vmem [shape: f32[1,3], index: 0, kind: input, shape index: {}]   ;;  %s45_s1 = inlined_call_operand.vmem [shape: f32[1,3], index: 1, kind: input, shape index: {}]   ;;  %s46_s2 = inlined_call_operand.vmem [shape: f32[1,3], index: 2, kind: output, shape index: {}]  }
   0x1   :  { %v11_v0 = vld [vmem:[%s44_s0] sm:$0x1] }
   0x2   :  { %v12_v1 = vld [vmem:[%s45_s1] sm:$0x1] }
   0x3   :  { %v13_v2 = vmul.f32 %v12_v1, %v11_v0 }
   0x5   :  { %15 = vst.msk [vmem:[%s46_s2] sm:$0x1] %vm14_vm0, %v13_v2 }

</bundles_post_ra>
